<compile_context>
chip_gen: v7x
topology: tpu7x:2x2x1
jax: 0.10.0
libtpu: 0.0.40
codegen_flags: <defaults>
</compile_context>

<pallas_src>
import math

import jax
import jax.numpy as jnp
import numpy as np
from jax.experimental import pallas as pl
from jax.experimental.pallas import tpu as pltpu


def _rocauc_pair_kernel(y_col_ref, y_row_ref, t_pos_ref, w_neg_ref,
                        out_ref, acc_ref):
    """One (class, i-tile, j-tile) step of the pairwise contraction.

    y_col_ref: (1, ti, 1)  scores for the "i" (candidate-positive) samples
    y_row_ref: (1, 1, tj)  scores for the "j" (candidate-negative) samples
    t_pos_ref: (1, 1, ti)  positive indicator for i samples (0 on padding)
    w_neg_ref: (1, 1, tj)  negative weight (1-t) for j samples (0 on padding)
    out_ref:   (1, 1, 128) per-class numerator (written on last tile only)
    acc_ref:   (1, tj)     f32 lane-wise accumulator (VMEM scratch)
    """
    i = pl.program_id(1)
    j = pl.program_id(2)
    ni = pl.num_programs(1)
    nj = pl.num_programs(2)

    @pl.when((i == 0) & (j == 0))
    def _():
        acc_ref[...] = jnp.zeros_like(acc_ref)

    y_col = y_col_ref[0]          # (ti, 1)  f32
    y_row = y_row_ref[0]          # (1, tj)  f32
    t_pos = t_pos_ref[0]          # (1, ti)  f32 in {0, 1}
    w_neg = w_neg_ref[0]          # (1, tj)  f32 in {0, 1}

    # Fused select chain; compares in f32, cast only for the MXU.
    m = jnp.where(
        y_col > y_row,
        jnp.float32(1.0),
        jnp.where(y_col == y_row, jnp.float32(0.5), jnp.float32(0.0)),
    ).astype(jnp.bfloat16)                                     # (ti, tj)

    # MXU: sum_i t_i * M[i, j]  ->  (1, tj), accumulated in f32.
    u = jnp.dot(t_pos.astype(jnp.bfloat16), m,
                preferred_element_type=jnp.float32)            # (1, tj)

    acc_ref[...] += u * w_neg

    @pl.when((i == ni - 1) & (j == nj - 1))
    def _():
        out_ref[...] = jnp.full(out_ref.shape, jnp.sum(acc_ref[...]),
                                dtype=out_ref.dtype)


def _round_up(x, m):
    return ((x + m - 1) // m) * m


def roc_auc_macro(y, t, *, ti_max=256, tj_max=1024):
    """y: (N, C) or (N,) float scores; t: same shape, binary {0,1} labels.

    Returns (macro_auc scalar, per_class aucs of shape (C,)).
    """
    y = jnp.asarray(y, jnp.float32)
    t = jnp.asarray(t, jnp.float32)
    if y.ndim == 1:
        y = y[:, None]
        t = t[:, None]
    N, C = y.shape

    # Tile sizes (lane-aligned); pad N to a common multiple of both tiles.
    np0 = _round_up(N, 128)
    tj = min(tj_max, np0)
    ti = min(ti_max, np0)
    lcm = ti * tj // math.gcd(ti, tj)
    Np = _round_up(N, lcm)

    pad = Np - N
    y_pad = jnp.pad(y, ((0, pad), (0, 0)))
    t_pad = jnp.pad(t, ((0, pad), (0, 0)))          # padded samples: t = 0
    w_pad = jnp.pad(1.0 - t, ((0, pad), (0, 0)))    # padded samples: 1-t = 0

    # Kernel layouts (class-major, samples on lanes; plus a pre-transposed
    # column view for the i side so the kernel never relayouts).
    y_row = y_pad.T.reshape(C, 1, Np)
    t_row = t_pad.T.reshape(C, 1, Np)
    w_row = w_pad.T.reshape(C, 1, Np)
    y_col = y_pad.T.reshape(C, Np, 1)

    grid = (C, Np // ti, Np // tj)

    numer = pl.pallas_call(
        _rocauc_pair_kernel,
        out_shape=jax.ShapeDtypeStruct((C, 1, 128), jnp.float32),
        grid_spec=pltpu.PrefetchScalarGridSpec(
            num_scalar_prefetch=0,
            grid=grid,
            in_specs=[
                pl.BlockSpec((1, ti, 1), lambda c, i, j: (c, i, 0)),   # y_col
                pl.BlockSpec((1, 1, tj), lambda c, i, j: (c, 0, j)),   # y_row
                pl.BlockSpec((1, 1, ti), lambda c, i, j: (c, 0, i)),   # t_pos
                pl.BlockSpec((1, 1, tj), lambda c, i, j: (c, 0, j)),   # w_neg
            ],
            out_specs=pl.BlockSpec((1, 1, 128), lambda c, i, j: (c, 0, 0)),
            scratch_shapes=[pltpu.VMEM((1, tj), jnp.float32)],
        ),
        compiler_params=pltpu.CompilerParams(
            dimension_semantics=("parallel", "arbitrary", "arbitrary")),
    )(y_col, y_row, t_row, w_row)

    numer = numer[:, 0, 0]                      # (C,)
    n_pos = jnp.sum(t, axis=0)                  # (C,)  (unpadded)
    n_neg = jnp.float32(N) - n_pos
    per_class = numer / (n_pos * n_neg)
    return jnp.mean(per_class), per_class


def _ref_roc_auc_macro(y, t):
    """Pure-numpy reference (same pairwise definition as sklearn's AUC)."""
    y = np.asarray(y, np.float64)
    t = np.asarray(t, np.float64)
    if y.ndim == 1:
        y = y[:, None]
        t = t[:, None]
    aucs = []
    for c in range(y.shape[1]):
        pos = y[t[:, c] == 1, c]
        neg = y[t[:, c] == 0, c]
        gt = (pos[:, None] > neg[None, :]).sum()
        eq = (pos[:, None] == neg[None, :]).sum()
        aucs.append((gt + 0.5 * eq) / (len(pos) * len(neg)))
    return float(np.mean(aucs)), np.array(aucs)


if __name__ == "__main__":
    key = jax.random.PRNGKey(0)
    k_y, k_t = jax.random.split(key)

    N, C = 128, 4  # samples, classes (multilabel indicator targets)
    y = jax.random.normal(k_y, (N, C), dtype=jnp.float32)
    t = (jax.random.uniform(k_t, (N, C)) > 0.5).astype(jnp.float32)
    # Guarantee both classes present in every column (AUC undefined otherwise).
    t = t.at[0, :].set(1.0)
    t = t.at[1, :].set(0.0)

    macro, per_class = roc_auc_macro(y, t)
    macro = jax.block_until_ready(macro)
    per_class = jax.block_until_ready(per_class)

    ref_macro, ref_per_class = _ref_roc_auc_macro(np.asarray(y), np.asarray(t))
    assert np.allclose(np.asarray(per_class), ref_per_class, atol=1e-5), (
        per_class, ref_per_class)
    assert abs(float(macro) - ref_macro) < 1e-5, (float(macro), ref_macro)

    print("KERNEL_OK")
</pallas_src>

<mosaic_0001>
module attributes {stable_mosaic.version = 11 : i64} {
  func.func @_rocauc_pair_kernel(%arg0: i32, %arg1: i32, %arg2: i32, %arg3: memref<1x128x1xf32, #tpu.memory_space<vmem>>, %arg4: memref<1x1x128xf32, #tpu.memory_space<vmem>>, %arg5: memref<1x1x128xf32, #tpu.memory_space<vmem>>, %arg6: memref<1x1x128xf32, #tpu.memory_space<vmem>>, %arg7: memref<1x1x128xf32, #tpu.memory_space<vmem>>, %arg8: memref<1x128xf32, #tpu.memory_space<vmem>>) attributes {dimension_semantics = [#tpu.dimension_semantics<parallel>, #tpu.dimension_semantics<arbitrary>, #tpu.dimension_semantics<arbitrary>], iteration_bounds = array<i64: 4, 1, 1>, scalar_prefetch = 0 : i64, scratch_operands = 1 : i64, tpu.core_type = #tpu.core_type<tc>, window_params = [{transform_indices = @transform_0, window_bounds = array<i64: 1, 128, 1>}, {transform_indices = @transform_1, window_bounds = array<i64: 1, 1, 128>}, {transform_indices = @transform_2, window_bounds = array<i64: 1, 1, 128>}, {transform_indices = @transform_3, window_bounds = array<i64: 1, 1, 128>}, {transform_indices = @transform_4, window_bounds = array<i64: 1, 1, 128>}]} {
    %c0_i32 = arith.constant 0 : i32
    %0 = arith.cmpi eq, %arg1, %c0_i32 : i32
    %c0_i32_0 = arith.constant 0 : i32
    %1 = arith.cmpi eq, %arg2, %c0_i32_0 : i32
    %2 = arith.andi %0, %1 : i1
    %3 = arith.extui %2 : i1 to i32
    %c0_i32_1 = arith.constant 0 : i32
    %4 = arith.cmpi ne, %3, %c0_i32_1 : i32
    scf.if %4 {
      %cst_23 = arith.constant 0.000000e+00 : f32
      %36 = vector.broadcast %cst_23 : f32 to vector<1x128xf32>
      %c0_24 = arith.constant 0 : index
      %c0_25 = arith.constant 0 : index
      %37 = vector.load %arg8[%c0_24, %c0_25] : memref<1x128xf32, #tpu.memory_space<vmem>>, vector<1x128xf32>
      tpu.vector_store %arg8[%c0_24, %c0_25], %36 {strides = array<i32>} : memref<1x128xf32, #tpu.memory_space<vmem>>, vector<1x128xf32>,
    } else {
    }
    %c0 = arith.constant 0 : index
    %c0_2 = arith.constant 0 : index
    %c0_3 = arith.constant 0 : index
    %5 = vector.load %arg3[%c0, %c0_2, %c0_3] : memref<1x128x1xf32, #tpu.memory_space<vmem>>, vector<1x128x1xf32>
    %6 = vector.shape_cast %5 : vector<1x128x1xf32> to vector<128x1xf32>
    %c0_4 = arith.constant 0 : index
    %c0_5 = arith.constant 0 : index
    %c0_6 = arith.constant 0 : index
    %7 = vector.load %arg4[%c0_4, %c0_5, %c0_6] : memref<1x1x128xf32, #tpu.memory_space<vmem>>, vector<1x1x128xf32>
    %8 = vector.shape_cast %7 : vector<1x1x128xf32> to vector<1x128xf32>
    %c0_7 = arith.constant 0 : index
    %c0_8 = arith.constant 0 : index
    %c0_9 = arith.constant 0 : index
    %9 = vector.load %arg5[%c0_7, %c0_8, %c0_9] : memref<1x1x128xf32, #tpu.memory_space<vmem>>, vector<1x1x128xf32>
    %10 = vector.shape_cast %9 : vector<1x1x128xf32> to vector<1x128xf32>
    %c0_10 = arith.constant 0 : index
    %c0_11 = arith.constant 0 : index
    %c0_12 = arith.constant 0 : index
    %11 = vector.load %arg6[%c0_10, %c0_11, %c0_12] : memref<1x1x128xf32, #tpu.memory_space<vmem>>, vector<1x1x128xf32>
    %12 = vector.shape_cast %11 : vector<1x1x128xf32> to vector<1x128xf32>
    %13 = vector.broadcast %6 : vector<128x1xf32> to vector<128x128xf32>
    %14 = vector.broadcast %8 : vector<1x128xf32> to vector<128x128xf32>
    %15 = arith.cmpf ogt, %13, %14 : vector<128x128xf32>
    %16 = vector.broadcast %6 : vector<128x1xf32> to vector<128x128xf32>
    %17 = vector.broadcast %8 : vector<1x128xf32> to vector<128x128xf32>
    %18 = arith.cmpf oeq, %16, %17 : vector<128x128xf32>
    %cst = arith.constant 5.000000e-01 : f32
    %cst_13 = arith.constant 0.000000e+00 : f32
    %19 = vector.broadcast %cst : f32 to vector<128x128xf32>
    %20 = vector.broadcast %cst_13 : f32 to vector<128x128xf32>
    %21 = arith.select %18, %19, %20 : vector<128x128xi1>, vector<128x128xf32>
    %cst_14 = arith.constant 1.000000e+00 : f32
    %22 = vector.broadcast %cst_14 : f32 to vector<128x128xf32>
    %23 = arith.select %15, %22, %21 : vector<128x128xi1>, vector<128x128xf32>
    %24 = arith.truncf %23 : vector<128x128xf32> to vector<128x128xbf16>
    %25 = arith.truncf %10 : vector<1x128xf32> to vector<1x128xbf16>
    %cst_15 = arith.constant dense<0.000000e+00> : vector<1x128xf32>
    %26 = tpu.matmul %25, %24, %cst_15 {dimension_numbers = #tpu.dot_dimension_numbers<[1], [0], [0], [1], [0, 0, 1, 1], [], []>} : vector<1x128xbf16>, vector<128x128xbf16>, vector<1x128xf32> -> vector<1x128xf32>
    %c0_16 = arith.constant 0 : index
    %c0_17 = arith.constant 0 : index
    %27 = vector.load %arg8[%c0_16, %c0_17] : memref<1x128xf32, #tpu.memory_space<vmem>>, vector<1x128xf32>
    %28 = arith.mulf %26, %12 : vector<1x128xf32>
    %29 = arith.addf %27, %28 : vector<1x128xf32>
    %c0_18 = arith.constant 0 : index
    %c0_19 = arith.constant 0 : index
    %30 = vector.load %arg8[%c0_18, %c0_19] : memref<1x128xf32, #tpu.memory_space<vmem>>, vector<1x128xf32>
    tpu.vector_store %arg8[%c0_18, %c0_19], %29 {strides = array<i32>} : memref<1x128xf32, #tpu.memory_space<vmem>>, vector<1x128xf32>,
    %c0_i32_20 = arith.constant 0 : i32
    %31 = arith.cmpi eq, %arg1, %c0_i32_20 : i32
    %c0_i32_21 = arith.constant 0 : i32
    %32 = arith.cmpi eq, %arg2, %c0_i32_21 : i32
    %33 = arith.andi %31, %32 : i1
    %34 = arith.extui %33 : i1 to i32
    %c0_i32_22 = arith.constant 0 : i32
    %35 = arith.cmpi ne, %34, %c0_i32_22 : i32
    scf.if %35 {
      %c0_23 = arith.constant 0 : index
      %c0_24 = arith.constant 0 : index
      %36 = vector.load %arg8[%c0_23, %c0_24] : memref<1x128xf32, #tpu.memory_space<vmem>>, vector<1x128xf32>
      %37 = vector.shape_cast %36 : vector<1x128xf32> to vector<1x1x128xf32>
      %cst_25 = arith.constant dense<0.000000e+00> : vector<1xf32>
      %38 = vector.multi_reduction <add>, %37, %cst_25 [1, 2] : vector<1x1x128xf32> to vector<1xf32>
      %39 = vector.shape_cast %38 : vector<1xf32> to vector<1x1x1xf32>
      %40 = vector.extract %39[0, 0, 0] : f32 from vector<1x1x1xf32>
      %41 = vector.broadcast %40 : f32 to vector<1x1x128xf32>
      %c0_26 = arith.constant 0 : index
      %c0_27 = arith.constant 0 : index
      %c0_28 = arith.constant 0 : index
      %42 = vector.load %arg7[%c0_26, %c0_27, %c0_28] : memref<1x1x128xf32, #tpu.memory_space<vmem>>, vector<1x1x128xf32>
      tpu.vector_store %arg7[%c0_26, %c0_27, %c0_28], %41 {strides = array<i32>} : memref<1x1x128xf32, #tpu.memory_space<vmem>>, vector<1x1x128xf32>,
    } else {
    }
    return
  }
  func.func @transform_0(%arg0: i32, %arg1: i32, %arg2: i32) -> (i32, i32, i32) {
    %c0_i32 = arith.constant 0 : i32
    %c0_i32_0 = arith.constant 0 : i32
    return %arg0, %arg1, %c0_i32 : i32, i32, i32
  }
  func.func @transform_1(%arg0: i32, %arg1: i32, %arg2: i32) -> (i32, i32, i32) {
    %c0_i32 = arith.constant 0 : i32
    %c0_i32_0 = arith.constant 0 : i32
    return %arg0, %c0_i32, %arg2 : i32, i32, i32
  }
  func.func @transform_2(%arg0: i32, %arg1: i32, %arg2: i32) -> (i32, i32, i32) {
    %c0_i32 = arith.constant 0 : i32
    %c0_i32_0 = arith.constant 0 : i32
    return %arg0, %c0_i32, %arg1 : i32, i32, i32
  }
  func.func @transform_3(%arg0: i32, %arg1: i32, %arg2: i32) -> (i32, i32, i32) {
    %c0_i32 = arith.constant 0 : i32
    %c0_i32_0 = arith.constant 0 : i32
    return %arg0, %c0_i32, %arg2 : i32, i32, i32
  }
  func.func @transform_4(%arg0: i32, %arg1: i32, %arg2: i32) -> (i32, i32, i32) {
    %c0_i32 = arith.constant 0 : i32
    %c0_i32_0 = arith.constant 0 : i32
    %c0_i32_1 = arith.constant 0 : i32
    return %arg0, %c0_i32, %c0_i32_0 : i32, i32, i32
  }
}

</mosaic_0001>

<bundles_post_ra>
// kernel: tpu_custom_call.1
= control target key start
LH: loop header
LB: loop body
LE: loop exit
PB: predicated region body
PF: predicated region fallthrough
CT: control target
= control target key end

     0   :  { %9 = vsyncpa [#allocation4], 0  ;;  %s1071_s0 = inlined_call_operand.vmem [shape: f32[4,128,1], index: 0, kind: input, shape index: {}]   ;;  %s1072_s1 = inlined_call_operand.vmem [shape: f32[4,1,128], index: 1, kind: input, shape index: {}]   ;;  %s1073_s2 = inlined_call_operand.vmem [shape: f32[4,1,128], index: 2, kind: input, shape index: {}]   ;;  %s1074_s3 = inlined_call_operand.vmem [shape: f32[4,1,128], index: 3, kind: input, shape index: {}]   ;;  %s1075_s4 = inlined_call_operand.hbm [shape: f32[4,1,128], index: 4, kind: output, shape index: {}]  }
   0x1   :  { %11 = vsyncpa [#allocation4 + $0x1], 0  ;;  %s884_s15 = smov 0   ;;  %s886_s16 = smov 0  }
   0x2   :  { %s888_s17 = smov 0   ;;  %s890_s18 = smov 0  }
   0x3   :  { %s892_s19 = smov 0   ;;  %s894_s20 = smov 0  }
   0x4 LB: > { %s672_s21 = sadd.s32 4294967295, %s853_s20   ;;  %s673_s22 = sadd.s32 4294967294, %s853_s20   ;;  %s853_s20 = sphi %s894_s20, %s17_s20   ;;  %s849_s19 = sphi %s892_s19, %s1082_s19   ;;  %s845_s18 = sphi %s890_s18, %s1081_s18   ;;  %s841_s17 = sphi %s888_s17, %s1080_s17   ;;  %s837_s16 = sphi %s886_s16, %s1079_s16   ;;  %s833_s15 = sphi %s884_s15, %s1078_s15  }
   0x5   : > { %s36_s23 = sadd.s32 1, %s849_s19  ;;  %s155_s24 = sadd.s32 1, %s841_s17 }
   0x6   : > { %p38_p0 = scmp.ge.s32.totalorder %s36_s23, 4  ;;  %p165_p1 = scmp.ne.s32.totalorder %s841_s17, %s837_s16 }
   0x7   : > { %p166_p2 = scmp.eq.s32.totalorder %s672_s21, 3  ;;  %p171_p3 = scmp.ne.s32.totalorder %s837_s16, %s833_s15 }
   0x8   : > { %s1084_s23 = smov (%p38_p0, %s36_s23), 0  ;;  %p172_p5 = scmp.eq.s32.totalorder %s673_s22, 3 }
   0x9   : > { %p924_p4 = por %p166_p2, %p165_p1  ;;  %s152_s26 = ssub.s32 %s849_s19, %s1084_s23 }
   0xa   : > { %p676_p6 = scmp.ge.s32.totalorder %s853_s20, 1  ;;  %p153_p7 = scmp.eq.s32.totalorder %s152_s26, 0 }
   0xb   : > { %p931_p8 = por %p172_p5, %p171_p3  ;;  %p230_p9 = scmp.lt.s32.totalorder %s853_s20, 5 }
   0xc   : > { %s937_s28 = scalar_select %p153_p7, %s841_s17, %s155_s24  }
   0xd   : > { %p231_p10 = pnand %p676_p6, %p230_p9 }
   0xe   : > { %p278_p11 = scmp.lt.s32.totalorder (!%p231_p10), %s845_s18, 3  ;;  %v855_v0 = vmov (!%p231_p10), 0   ;;  %v856_v1 = vmov (!%p231_p10), 0.0   ;;  %vm857_vm0 = vmmov (!%p231_p10), 0   ;;  %s275_s24 = sand.u32 (!%p231_p10), 1, %s837_s16  }
   0xf   : > { %234 = sbr.rel (%p231_p10) target bundleno = 639 (0x27f), region = 36  ;;  %774 = vset.pattern.permute.xlu1 (!%p231_p10), %v855_v0  ;;  %773 = vset.pattern.permute.xlu0 (!%p231_p10), %v855_v0  ;;  %312 = vst [vmem:[#allocation2] sm:$0x1] (!%p231_p10), %v856_v1  ;;  %s276_s26 = scalar_lea.vmem (!%p231_p10), [#allocation3], %s275_s24 }
  0x10   : > { %693 = vmatprep.subr.bf16.mxu0 (!%p231_p10), %v856_v1  ;;  %709 = vmatprep.mubr.msk.bf16.mxu0 (!%p231_p10), %vm857_vm0, %v856_v1  ;;  %s552_s9 = scalar_lea.sflag (!%p231_p10), [#allocation4], %s275_s24 }
  0x16   : > { %s942_s29 = scalar_select %p278_p11, %s845_s18, 3 }
  0x18   : > { %s683_s30 = sshll.u32 %s942_s29, 7  ;;  %s292_s10 = scalar_lea.vmem %s1072_s1, %s942_s29 }
  0x19   : > { %s285_s7 = scalar_lea.vmem %s1071_s0, %s683_s30  ;;  %v954_v18 = vld [vmem:[%s292_s10] ss:$0 sm:$0xff]  ;;  %s298_s13 = scalar_lea.vmem %s1073_s2, %s942_s29 }
  0x1a   : > { %v315_v2 = vld [vmem:[%s285_s7 + $0x10] sm:$0xff]  ;;  %v313_v3 = vld [vmem:[%s285_s7] sm:$0xff]  ;;  %v316_v4 = vld [vmem:[%s285_s7 + $0x18] sm:$0xff]  ;;  %s304_s22 = scalar_lea.vmem %s1074_s3, %s942_s29  ;;  %s564_s29 = sshll.u32 %s276_s26, 4  ;;  %s1021_s29 = int_to_ptr.vmem [resolvable:$true] %s564_s29 }
  0x1b   : > { %344 = vperm.xlu1 %774, %v315_v2   ;;  %334 = vperm.xlu0 %773, %v313_v3   ;;  %v314_v5 = vld [vmem:[%s285_s7 + $0x8] sm:$0xff]  ;;  %v317_v7 = vld [vmem:[%s285_s7 + $0x20] sm:$0xff]  ;;  %v320_v8 = vld [vmem:[%s285_s7 + $0x38] sm:$0xff]  ;;  %s680_s30 = sshll.u32 %s845_s18, 4  ;;  %s775_s10 = scalar_lea.vmem %s1021_s29, 16 }
  0x1c   : > { %v318_v6 = vld [vmem:[%s285_s7 + $0x28] sm:$0xff]  ;;  %v319_v9 = vld [vmem:[%s285_s7 + $0x30] sm:$0xff]  ;;  %v321_v11 = vld [vmem:[%s285_s7 + $0x40] sm:$0xff]  ;;  %s1026_s8 = scalar_lea.hbm %s1075_s4, %s680_s30  ;;  %p776_p12 = scmp.ne.s32.totalorder %s1021_s29, %s775_s10 }
  0x1d   : > { %v322_v10 = vld [vmem:[%s285_s7 + $0x48] sm:$0xff]  ;;  %v324_v12 = vld [vmem:[%s285_s7 + $0x58] sm:$0xff]  ;;  %v323_v13 = vld [vmem:[%s285_s7 + $0x50] sm:$0xff]  ;;  %s858_s18 = smov [#allocation3]  }
  0x1e   : > { %v326_v14 = vld [vmem:[%s285_s7 + $0x68] sm:$0xff]  ;;  %v325_v15 = vld [vmem:[%s285_s7 + $0x60] sm:$0xff]  ;;  %v328_v16 = vld [vmem:[%s285_s7 + $0x78] sm:$0xff]  ;;  %p777_p13 = pnand %p776_p12, %p924_p4  ;;  %s779_s11 = sshll.u32 %s858_s18, 4  ;;  %s780_s11 = int_to_ptr.vmem [resolvable:$false] %s779_s11 }
  0x1f   : > { %349 = vperm.xlu1 %774, %v316_v4   ;;  %339 = vperm.xlu0 %773, %v314_v5   ;;  %v327_v17 = vld [vmem:[%s285_s7 + $0x70] sm:$0xff]  ;;  %s781_s12 = scalar_lea.vmem %s780_s11, 32  ;;  %p782_p1 = scmp.lt.s32.totalorder %s1021_s29, %s780_s11 }
  0x20   : > { %p778_p0 = pneg %p777_p13  ;;  %p783_p2 = scmp.lt.s32.totalorder %s781_s12, %s775_s10 }
  0x22   : > { %p784_p3 = por %p783_p2, %p782_p1 }
  0x23   : > { %359 = vperm.xlu1 %774, %v318_v6   ;;  %354 = vperm.xlu0 %773, %v317_v7  }
  0x24   : > { %p785_p5 = pnand %p784_p3, %p778_p0 }
  0x27   : > { %369 = vperm.xlu1 %774, %v320_v8   ;;  %364 = vperm.xlu0 %773, %v319_v9  }
  0x2b   : > { %379 = vperm.xlu1 %774, %v322_v10   ;;  %374 = vperm.xlu0 %773, %v321_v11   ;;  %v330_v11 = vld [vmem:[%s298_s13] sm:$0x1] }
  0x2f   : > { %389 = vperm.xlu1 %774, %v324_v12   ;;  %384 = vperm.xlu0 %773, %v323_v13   ;;  %v490_v13 = vpack.c.bf16 %v330_v11, %v330_v11 }
  0x33   : > { %399 = vperm.xlu1 %774, %v326_v14   ;;  %394 = vperm.xlu0 %773, %v325_v15   ;;  %v331_v14 = vld [vmem:[%s304_s22] sm:$0x1] }
  0x37   : > { %409 = vperm.xlu1 %774, %v328_v16   ;;  %404 = vperm.xlu0 %773, %v327_v17   ;;  %v531_v16 = vld [vmem:[#allocation2] sm:$0x1] }
  0x9a   : > { %v345_v19 = vpop.permute.xlu1 %344  ;;  %v335_v20 = vpop.permute.xlu0 %334 }
  0x9b   : > { %vm434_vm1 = vcmp.eq.f32.partialorder %v335_v20, %v954_v18  ;;  %vm436_vm2 = vcmp.eq.f32.partialorder %v345_v19, %v954_v18  ;;  %vm418_vm3 = vcmp.gt.f32.partialorder %v335_v20, %v954_v18  ;;  %vm420_vm4 = vcmp.gt.f32.partialorder %v345_v19, %v954_v18 }
  0x9c   : > { %v450_v21 = vsel %vm434_vm1, 0.5, %v856_v1  ;;  %v452_v24 = vsel %vm436_vm2, 0.5, %v856_v1 }
  0x9d   : > { %v466_v27 = vsel %vm418_vm3, 1.0, %v450_v21  ;;  %v468_v32 = vsel %vm420_vm4, 1.0, %v452_v24 }
  0x9e   : > { %v350_v22 = vpop.permute.xlu1 %349  ;;  %v340_v23 = vpop.permute.xlu0 %339 }
  0x9f   : > { %vm437_vm5 = vcmp.eq.f32.partialorder %v350_v22, %v954_v18  ;;  %vm419_vm6 = vcmp.gt.f32.partialorder %v340_v23, %v954_v18  ;;  %vm435_vm7 = vcmp.eq.f32.partialorder %v340_v23, %v954_v18  ;;  %vm421_vm8 = vcmp.gt.f32.partialorder %v350_v22, %v954_v18 }
  0xa0   : > { %v453_v25 = vsel %vm437_vm5, 0.5, %v856_v1  ;;  %v451_v26 = vsel %vm435_vm7, 0.5, %v856_v1 }
  0xa1   : > { %v467_v28 = vsel %vm419_vm6, 1.0, %v451_v26  ;;  %v469_v33 = vsel %vm421_vm8, 1.0, %v453_v25 }
  0xa2   : > { %v360_v29 = vpop.permute.xlu1 %359  ;;  %v355_v30 = vpop.permute.xlu0 %354  ;;  %v482_v31 = vpack.c.bf16 %v467_v28, %v466_v27  ;;  %v483_v36 = vpack.c.bf16 %v469_v33, %v468_v32 }
  0xa3   : > { %vm439_vm9 = vcmp.eq.f32.partialorder %v360_v29, %v954_v18  ;;  %vm438_vm10 = vcmp.eq.f32.partialorder %v355_v30, %v954_v18  ;;  %vm423_vm11 = vcmp.gt.f32.partialorder %v360_v29, %v954_v18  ;;  %vm422_vm12 = vcmp.gt.f32.partialorder %v355_v30, %v954_v18 }
  0xa4   : > { %v455_v34 = vsel %vm439_vm9, 0.5, %v856_v1  ;;  %v454_v35 = vsel %vm438_vm10, 0.5, %v856_v1  ;;  %694 = vmatpush3.bf16.msra.mxu0 %v482_v31 }
  0xa5   : > { %695 = vmatprep.subr.bf16.mxu0 %v856_v1  ;;  %v471_v39 = vsel %vm423_vm11, 1.0, %v455_v34  ;;  %v470_v40 = vsel %vm422_vm12, 1.0, %v454_v35 }
  0xa6   : > { %v370_v37 = vpop.permute.xlu1 %369  ;;  %v365_v38 = vpop.permute.xlu0 %364  ;;  %v484_v43 = vpack.c.bf16 %v471_v39, %v470_v40 }
  0xa7   : > { %vm441_vm13 = vcmp.eq.f32.partialorder %v370_v37, %v954_v18  ;;  %vm440_vm14 = vcmp.eq.f32.partialorder %v365_v38, %v954_v18  ;;  %vm425_vm15 = vcmp.gt.f32.partialorder %v370_v37, %v954_v18  ;;  %vm424_vm0 = vcmp.gt.f32.partialorder %v365_v38, %v954_v18 }
  0xa8   : > { %v457_v41 = vsel %vm441_vm13, 0.5, %v856_v1  ;;  %v456_v42 = vsel %vm440_vm14, 0.5, %v856_v1  ;;  %696 = vmatpush3.bf16.msra.mxu0 %v483_v36 }
  0xa9   : > { %697 = vmatprep.subr.bf16.mxu0 %v856_v1  ;;  %v473_v46 = vsel %vm425_vm15, 1.0, %v457_v41  ;;  %v472_v47 = vsel %vm424_vm0, 1.0, %v456_v42 }
  0xaa   : > { %v380_v44 = vpop.permute.xlu1 %379  ;;  %v375_v45 = vpop.permute.xlu0 %374  ;;  %v485_v50 = vpack.c.bf16 %v473_v46, %v472_v47 }
  0xab   : > { %vm443_vm1 = vcmp.eq.f32.partialorder %v380_v44, %v954_v18  ;;  %vm442_vm2 = vcmp.eq.f32.partialorder %v375_v45, %v954_v18  ;;  %vm427_vm3 = vcmp.gt.f32.partialorder %v380_v44, %v954_v18  ;;  %vm426_vm4 = vcmp.gt.f32.partialorder %v375_v45, %v954_v18 }
  0xac   : > { %v459_v48 = vsel %vm443_vm1, 0.5, %v856_v1  ;;  %v458_v49 = vsel %vm442_vm2, 0.5, %v856_v1  ;;  %698 = vmatpush3.bf16.msra.mxu0 %v484_v43  ;;  %vm538_vm1 = vcmask 1040384  }
  0xad   : > { %699 = vmatprep.subr.bf16.mxu0 %v856_v1  ;;  %v475_v53 = vsel %vm427_vm3, 1.0, %v459_v48  ;;  %v474_v54 = vsel %vm426_vm4, 1.0, %v458_v49 }
  0xae   : > { %v390_v51 = vpop.permute.xlu1 %389  ;;  %v385_v52 = vpop.permute.xlu0 %384  ;;  %v486_v57 = vpack.c.bf16 %v475_v53, %v474_v54 }
  0xaf   : > { %vm445_vm5 = vcmp.eq.f32.partialorder %v390_v51, %v954_v18  ;;  %vm444_vm6 = vcmp.eq.f32.partialorder %v385_v52, %v954_v18  ;;  %vm429_vm7 = vcmp.gt.f32.partialorder %v390_v51, %v954_v18  ;;  %vm428_vm8 = vcmp.gt.f32.partialorder %v385_v52, %v954_v18 }
  0xb0   : > { %v461_v55 = vsel %vm445_vm5, 0.5, %v856_v1  ;;  %v460_v56 = vsel %vm444_vm6, 0.5, %v856_v1  ;;  %700 = vmatpush3.bf16.msra.mxu0 %v485_v50 }
  0xb1   : > { %701 = vmatprep.subr.bf16.mxu0 %v856_v1  ;;  %v477_v60 = vsel %vm429_vm7, 1.0, %v461_v55  ;;  %v476_v61 = vsel %vm428_vm8, 1.0, %v460_v56 }
  0xb2   : > { %v400_v58 = vpop.permute.xlu1 %399  ;;  %v395_v59 = vpop.permute.xlu0 %394  ;;  %v487_v0 = vpack.c.bf16 %v477_v60, %v476_v61 }
  0xb3   : > { %vm447_vm9 = vcmp.eq.f32.partialorder %v400_v58, %v954_v18  ;;  %vm446_vm10 = vcmp.eq.f32.partialorder %v395_v59, %v954_v18  ;;  %vm431_vm11 = vcmp.gt.f32.partialorder %v400_v58, %v954_v18  ;;  %vm430_vm12 = vcmp.gt.f32.partialorder %v395_v59, %v954_v18 }
  0xb4   : > { %v463_v62 = vsel %vm447_vm9, 0.5, %v856_v1  ;;  %v462_v63 = vsel %vm446_vm10, 0.5, %v856_v1  ;;  %702 = vmatpush3.bf16.msra.mxu0 %v486_v57 }
  0xb5   : > { %703 = vmatprep.subr.bf16.mxu0 %v856_v1  ;;  %v479_v4 = vsel %vm431_vm11, 1.0, %v463_v62  ;;  %v478_v5 = vsel %vm430_vm12, 1.0, %v462_v63 }
  0xb6   : > { %v410_v2 = vpop.permute.xlu1 %409  ;;  %v405_v3 = vpop.permute.xlu0 %404  ;;  %v488_v8 = vpack.c.bf16 %v479_v4, %v478_v5 }
  0xb7   : > { %vm449_vm13 = vcmp.eq.f32.partialorder %v410_v2, %v954_v18  ;;  %vm448_vm14 = vcmp.eq.f32.partialorder %v405_v3, %v954_v18  ;;  %vm433_vm15 = vcmp.gt.f32.partialorder %v410_v2, %v954_v18  ;;  %vm432_vm0 = vcmp.gt.f32.partialorder %v405_v3, %v954_v18 }
  0xb8   : > { %v465_v6 = vsel %vm449_vm13, 0.5, %v856_v1  ;;  %v464_v7 = vsel %vm448_vm14, 0.5, %v856_v1  ;;  %704 = vmatpush3.bf16.msra.mxu0 %v487_v0 }
  0xb9   : > { %705 = vmatprep.subr.bf16.mxu0 %v856_v1  ;;  %v481_v9 = vsel %vm433_vm15, 1.0, %v465_v6  ;;  %v480_v10 = vsel %vm432_vm0, 1.0, %v464_v7 }
  0xba   : > { %v489_v12 = vpack.c.bf16 %v481_v9, %v480_v10 }
  0xbc   : > { %706 = vmatpush3.bf16.msra.mxu0 %v488_v8 }
  0xbd   : > { %707 = vmatprep.subr.bf16.mxu0 %v856_v1 }
  0xc0   : > { %708 = vmatpush3.bf16.msra.mxu0 %v489_v12 }
  0xc3   : > { %710 = vmatmul.mubr.bf16.vlgmr.msra.gmra.mrb[0].mxu0 %v490_v13 }
 0x196   : > { %v525_v15 = vpop.f32.mrb[0].mxu0 }
 0x197   : > { %v532_v17 = vmul.f32 %v525_v15, %v331_v14  ;;  %v711_v18 = vpop.f32.mrb[1].mxu0 }
 0x198   : > { %v528_v19 = vpop.f32.mrb[2].mxu0 }
 0x199   : > { %v533_v20 = vadd.f32 %v532_v17, %v531_v16  ;;  %v712_v21 = vpop.f32.mrb[3].mxu0 }
 0x19b   : > { %534 = vst [vmem:[#allocation2] sm:$0x1] %v533_v20 }
 0x1a2   : > { %v537_v1 = vld [vmem:[#allocation2] sm:$0x1] }
 0x1a3   : > { %v539_v22 = vsel %vm538_vm1, %v537_v1, 0.0 }
 0x1a4   : > { %540 = vadd.xlane.f32.xlu0 %v539_v22 }
 0x231   : > { %v541_v23 = vpop.xlane.xlu0 %540 }
 0x232   : > { %v542_v24 = vrot.slane %v541_v23, 4 }
 0x234   : > { %v543_v25 = vadd.f32 %v542_v24, %v541_v23 }
 0x236   : > { %v544_v26 = vrot.slane %v543_v25, 2 }
 0x238   : > { %v545_v27 = vadd.f32 %v544_v26, %v543_v25 }
 0x23a   : > { %v546_v28 = vrot.slane %v545_v27, 1 }
 0x23c   : > { %v547_v29 = vadd.f32 %v546_v28, %v545_v27 }
 0x23e   : > { %713 = vpush %v547_v29 }
 0x26f   : > { %s714_s5 = spop %713 }
 0x270   : > { %v549_v30 = vstv %s714_s5 }
 0x271   : > { %550 = vst [vmem:[%s276_s26] sm:$0x1] %v549_v30 }
 0x272   : > { %788 = shalt.err (!%p785_p5)
}
 0x273   : > { %s789_s13 = scalar_lea.hbm %s1026_s8, 16  ;;  %s793_s22 = scalar_lea.hbm %s1075_s4, 64 }
 0x274   : > { %p790_p6 = scmp.ne.s32.totalorder %s1026_s8, %s789_s13  ;;  %p794_p10 = scmp.lt.u32.totalorder %s1026_s8, %s1075_s4 }
 0x275   : > { %p795_p11 = scmp.lt.u32.totalorder %s793_s22, %s789_s13  ;;  %p797_p13 = scmp.lt.u32.totalorder %s789_s13, %s1026_s8 }
 0x276   : > { %p791_p7 = pnand %p790_p6, %p924_p4 }
 0x277   : > { %p796_p12 = por %p795_p11, %p794_p10 }
 0x278   : > { %p792_p9 = pneg %p791_p7 }
 0x279   : > { %p798_p0 = por %p797_p13, %p796_p12 }
 0x27b   : > { %p799_p1 = pnand %p798_p0, %p792_p9 }
 0x27d   : > { %802 = shalt.err (!%p799_p1)
}
 0x27e   : > { %715 = dma.vmem_to_hbm [thread:$0]  (%p924_p4), %s1021_s29, 16, %s1026_s8, %s552_s9  }
 0x27f PF: > { %p721_p2 = scmp.ge.s32.totalorder %s853_s20, 2  ;;  %s576_s30 = sand.u32 1, %s833_s15  }
 0x280   : > { %s577_s5 = scalar_lea.sflag [#allocation4], %s576_s30 }
 0x281   : > { %p718_p3 = pnand %p721_p2, %p931_p8 }
 0x283   : > { %828 = dma.done.wait (!%p718_p3), %s577_s5, 16  }
 0x284   : > { %830 = vsyncadd (!%p718_p3), %s577_s5, 4294967280  ;;  %s17_s20 = sadd.s32 1, %s853_s20   ;;  %s1078_s15 = smov %s837_s16 }
 0x285   : > { %p14_p5 = scmp.ge.s32.totalorder %s17_s20, 6   ;;  %s1079_s16 = smov %s841_s17 }
 0x286   : > { %s1080_s17 = smov %s937_s28  ;;  %s1081_s18 = smov %s849_s19 }
 0x287   : > { %s1082_s19 = smov %s1084_s23  ;;  %16 = sbr.rel (!%p14_p5) target bundleno = 4 (0x4), region = 88 }
 0x28e   :  { %581 = vsyncpa [#allocation4], 1 }
 0x28f   :  { %583 = vsyncpa [#allocation4 + $0x1], 1 }

</bundles_post_ra>
